<compile_context>
chip_gen: v7x
topology: tpu7x:2x2x1
jax: 0.10.0
libtpu: 0.0.40
codegen_flags: <defaults>
</compile_context>

<pallas_src>
import numpy as np
import jax
import jax.numpy as jnp
from jax.experimental import pallas as pl
from jax.experimental.pallas import tpu as pltpu

_NEG = -1e30          # "minus infinity" that stays NaN-free through the exp/max algebra
_LANES = 128


def _make_asp_kernel(C, H, t_tile, t_true, out_pad):
    n_lane_blocks = t_tile // _LANES
    needs_mask = (t_true % t_tile) != 0

    def kernel(x_ref, w1_ref, b1_ref, w2_ref, out_ref, m_sc, l_sc, s1_sc, s2_sc):
        ti = pl.program_id(1)

        @pl.when(ti == 0)
        def _init():
            m_sc[...] = jnp.full(m_sc.shape, _NEG, m_sc.dtype)
            l_sc[...] = jnp.zeros(l_sc.shape, l_sc.dtype)
            s1_sc[...] = jnp.zeros(s1_sc.shape, s1_sc.dtype)
            s2_sc[...] = jnp.zeros(s2_sc.shape, s2_sc.dtype)

        x = x_ref[0]                                       # (C, t_tile)  f32 stats path
        w1 = w1_ref[...]                                   # (H, C)   bf16
        w2 = w2_ref[...]                                   # (C, H)   bf16, BN scale folded
        b1 = b1_ref[...].astype(jnp.float32)               # (H, 1)

        # attention logits; the per-channel bias / BN shift are softmax-invariant (dropped).
        h = jnp.dot(w1, x.astype(w1.dtype), preferred_element_type=jnp.float32)
        h = jnp.maximum(h + b1, 0.0)                                            # (H, Tt)
        a = jnp.dot(w2, h.astype(w2.dtype), preferred_element_type=jnp.float32)  # (C, Tt)

        if needs_mask:
            col = jax.lax.broadcasted_iota(jnp.int32, a.shape, 1) + ti * t_tile
            a = jnp.where(col < t_true, a, _NEG)

        # ---- lane-blocked online softmax: no cross-lane reductions in the hot loop ----
        m_prev = m_sc[...]                                 # (C, 128)
        m_new = m_prev
        for j in range(n_lane_blocks):
            m_new = jnp.maximum(m_new, a[:, j * _LANES:(j + 1) * _LANES])
        alpha = jnp.exp(m_prev - m_new)

        se = jnp.zeros(m_new.shape, jnp.float32)
        sxe = jnp.zeros(m_new.shape, jnp.float32)
        sx2e = jnp.zeros(m_new.shape, jnp.float32)
        for j in range(n_lane_blocks):
            sl = slice(j * _LANES, (j + 1) * _LANES)
            e = jnp.exp(a[:, sl] - m_new)                  # (C, 128)
            xb = x[:, sl].astype(jnp.float32)              # upcast inside the multiply path
            xe = xb * e
            se = se + e
            sxe = sxe + xe
            sx2e = sx2e + xb * xe
        l_sc[...] = alpha * l_sc[...] + se
        s1_sc[...] = alpha * s1_sc[...] + sxe
        s2_sc[...] = alpha * s2_sc[...] + sx2e
        m_sc[...] = m_new

        @pl.when(ti == pl.num_programs(1) - 1)
        def _finalize():
            m = m_sc[...]                                  # (C, 128)
            g = jnp.max(m, axis=-1, keepdims=True)         # cross-lane max (once, finalize)
            r = jnp.exp(m - g)                             # lane-stream rescale
            ones = jnp.ones((1, _LANES), jnp.float32)

            def lane_sum(v):                               # (C,128) -> (1,C) lane-dense
                return jax.lax.dot_general(ones, v, (((1,), (1,)), ((), ())),
                                           preferred_element_type=jnp.float32)

            l = lane_sum(l_sc[...] * r)
            s1 = lane_sum(s1_sc[...] * r)
            s2 = lane_sum(s2_sc[...] * r)
            inv = 1.0 / l                                  # exact reciprocal (per review)
            mu = s1 * inv
            sg = jnp.sqrt(jnp.maximum(s2 * inv - mu * mu, 1e-5))
            row = jnp.concatenate([mu, sg], axis=-1)       # (1, 2C) lane-dense
            if out_pad > 2 * C:
                row = jnp.concatenate(
                    [row, jnp.zeros((1, out_pad - 2 * C), jnp.float32)], axis=-1)
            out_ref[0] = row.astype(out_ref.dtype)         # single full-block store

    return kernel


def _round_up(v, m):
    return ((v + m - 1) // m) * m


def _vmem_capacity_bytes():
    try:
        return int(pltpu.get_tpu_info().vmem_capacity_bytes)
    except Exception:
        return 64 << 20                       # conservative default (v7x per-core VMEM)


def _estimate_vmem_bytes(C, H, t_tile, out_pad, x_item, w_item):
    x_blk = C * t_tile * x_item               # one x time slab
    weights = 2 * H * C * w_item              # conv1 + conv2 (BN-folded) weights
    b1 = H * _LANES * 4                       # (H,1) block, lane-padded
    out_blk = out_pad * 4
    pipelined = 2 * (x_blk + weights + b1 + out_blk)       # double-buffered operands
    scratch = 4 * C * _LANES * 4                           # online-softmax state
    temps = (H + 2 * C) * t_tile * 4 + 6 * C * _LANES * 4  # h, a (+mask), block temporaries
    return pipelined + scratch + temps


def _pick_tiling(C, H, T, out_pad, x_item, w_item, t_tile=None):
    cap = _vmem_capacity_bytes()
    budget = int(cap * 0.6)                   # headroom for compiler-internal scratch
    t_cap = _round_up(max(T, 1), _LANES)
    if t_tile is None:
        cands = [t for t in (4096, 2048, 1024, 512, 256, 128) if t <= t_cap] or [_LANES]
        t_tile = cands[-1]
        for t in cands:                       # largest time tile that fits the budget
            if _estimate_vmem_bytes(C, H, t, out_pad, x_item, w_item) <= budget:
                t_tile = t
                break
    assert t_tile % _LANES == 0
    t_pad = _round_up(max(T, 1), t_tile)
    est = _estimate_vmem_bytes(C, H, t_tile, out_pad, x_item, w_item)
    vmem_limit = int(min(cap, max(est + (8 << 20), 32 << 20)))
    return t_tile, t_pad, vmem_limit


def asp_forward(x, params, *, weight_dtype=jnp.bfloat16, x_dtype=jnp.float32, t_tile=None):
    """x: (B, in_planes*8, outmap_size, T) -> (B, 2*C) float32, C = in_planes*8*outmap."""
    w1, b1, gamma, beta, mean, var, w2, b2 = params
    del b2, beta, mean                        # softmax-invariant terms (see kernel header)
    B, T = x.shape[0], x.shape[-1]
    xr = x.reshape(B, -1, T)
    C = xr.shape[1]
    H = w1.shape[0]

    # Fold eval-mode BatchNorm1d scale into conv2's weight; the shift cancels in softmax.
    scale = gamma.reshape(-1) * jax.lax.rsqrt(var.reshape(-1) + 1e-5)         # (H,)
    w2f = w2.reshape(C, H) * scale[None, :]

    out_pad = _round_up(2 * C, _LANES)
    t_tile, t_pad, vmem_limit = _pick_tiling(
        C, H, T, out_pad, jnp.dtype(x_dtype).itemsize, jnp.dtype(weight_dtype).itemsize,
        t_tile)
    n_t = t_pad // t_tile

    xp = xr.astype(x_dtype)
    if t_pad != T:
        xp = jnp.pad(xp, ((0, 0), (0, 0), (0, t_pad - T)))
    w1c = w1.reshape(H, C).astype(weight_dtype)
    w2c = w2f.astype(weight_dtype)
    b1c = b1.reshape(H, 1).astype(jnp.float32)

    kernel = _make_asp_kernel(C, H, t_tile, T, out_pad)
    out = pl.pallas_call(
        kernel,
        out_shape=jax.ShapeDtypeStruct((B, 1, out_pad), jnp.float32),
        grid=(B, n_t),
        in_specs=[
            pl.BlockSpec((1, C, t_tile), lambda bi, ti: (bi, 0, ti)),   # x time slab
            pl.BlockSpec((H, C), lambda bi, ti: (0, 0)),                # conv1 weight
            pl.BlockSpec((H, 1), lambda bi, ti: (0, 0)),                # conv1 bias
            pl.BlockSpec((C, H), lambda bi, ti: (0, 0)),                # conv2 weight (BN folded)
        ],
        out_specs=pl.BlockSpec((1, 1, out_pad), lambda bi, ti: (bi, 0, 0)),
        scratch_shapes=[
            pltpu.VMEM((C, _LANES), jnp.float32),     # running per-lane max
            pltpu.VMEM((C, _LANES), jnp.float32),     # running per-lane denominator
            pltpu.VMEM((C, _LANES), jnp.float32),     # running per-lane sum(x * e)
            pltpu.VMEM((C, _LANES), jnp.float32),     # running per-lane sum(x^2 * e)
        ],
        compiler_params=pltpu.CompilerParams(
            dimension_semantics=("parallel", "arbitrary"),
            vmem_limit_bytes=vmem_limit),
    )(xp, w1c, b1c, w2c)
    return out.reshape(B, out_pad)[:, :2 * C]


def asp_reference(x, params, weight_dtype=jnp.bfloat16, x_dtype=jnp.float32):
    """Pure-JAX mirror of the PyTorch forward (eval-mode BN, explicit softmax), using the
    same operand dtypes as the kernel so the comparison is apples-to-apples."""
    w1, b1, gamma, beta, mean, var, w2, b2 = params
    B, T = x.shape[0], x.shape[-1]
    xr = x.reshape(B, -1, T).astype(x_dtype).astype(jnp.float32)
    xm = xr.astype(weight_dtype)
    h = jnp.einsum('hc,bct->bht', w1.astype(weight_dtype), xm,
                   preferred_element_type=jnp.float32) + b1[None]
    h = jnp.maximum(h, 0.0)
    h = (h - mean[None]) * jax.lax.rsqrt(var[None] + 1e-5) * gamma[None] + beta[None]
    a = jnp.einsum('ch,bht->bct', w2.astype(weight_dtype), h.astype(weight_dtype),
                   preferred_element_type=jnp.float32) + b2[None]
    w = jax.nn.softmax(a, axis=2)
    mu = jnp.sum(xr * w, axis=2)
    sg = jnp.sqrt(jnp.maximum(jnp.sum(xr * xr * w, axis=2) - mu * mu, 1e-5))
    return jnp.concatenate([mu, sg], axis=1)


def make_params(key, C):
    """Deterministic synthetic parameters (shapes from ASP.__init__, hidden=128)."""
    ks = jax.random.split(key, 8)
    w1 = jax.random.normal(ks[0], (128, C), jnp.float32) * 0.1        # Conv1d(C,128,1).weight
    b1 = jax.random.normal(ks[1], (128, 1), jnp.float32) * 0.1
    gamma = 1.0 + 0.1 * jax.random.normal(ks[2], (128, 1), jnp.float32)
    beta = 0.1 * jax.random.normal(ks[3], (128, 1), jnp.float32)
    mean = 0.1 * jax.random.normal(ks[4], (128, 1), jnp.float32)
    var = jnp.abs(1.0 + 0.1 * jax.random.normal(ks[5], (128, 1), jnp.float32))
    w2 = jax.random.normal(ks[6], (C, 128), jnp.float32) * 0.1        # Conv1d(128,C,1).weight
    b2 = jax.random.normal(ks[7], (C, 1), jnp.float32) * 0.1
    return (w1, b1, gamma, beta, mean, var, w2, b2)


if __name__ == "__main__":
    # ASP(in_planes=2, acoustic_dim=16): outmap_size = 2, C = 2*8*2 = 32, out_dim = 64
    in_planes, acoustic_dim = 2, 16
    outmap_size = acoustic_dim // 8
    C = in_planes * 8 * outmap_size
    B, T = 2, 8

    key = jax.random.PRNGKey(0)
    kx, kp, kx2 = jax.random.split(key, 3)
    x = jax.random.normal(kx, (B, in_planes * 8, outmap_size, T), jnp.float32)
    params = make_params(kp, C)

    out = jax.block_until_ready(asp_forward(x, params))
    ref = asp_reference(x, params)
    assert out.shape == (B, 2 * C), out.shape
    np.testing.assert_allclose(np.asarray(out), np.asarray(ref), rtol=2e-2, atol=2e-2)

    # Second case: multi-tile time axis with a masked ragged tail (T=300, t_tile=128).
    T2 = 300
    x2 = jax.random.normal(kx2, (B, in_planes * 8, outmap_size, T2), jnp.float32)
    out2 = jax.block_until_ready(asp_forward(x2, params, t_tile=128))
    ref2 = asp_reference(x2, params)
    np.testing.assert_allclose(np.asarray(out2), np.asarray(ref2), rtol=2e-2, atol=2e-2)

    print("KERNEL_OK")
</pallas_src>

<mosaic_0001>
module attributes {stable_mosaic.version = 11 : i64} {
  func.func @kernel(%arg0: i32, %arg1: i32, %arg2: memref<1x32x128xf32, #tpu.memory_space<vmem>>, %arg3: memref<128x32xbf16, #tpu.memory_space<vmem>>, %arg4: memref<128x1xf32, #tpu.memory_space<vmem>>, %arg5: memref<32x128xbf16, #tpu.memory_space<vmem>>, %arg6: memref<1x1x128xf32, #tpu.memory_space<vmem>>, %arg7: memref<32x128xf32, #tpu.memory_space<vmem>>, %arg8: memref<32x128xf32, #tpu.memory_space<vmem>>, %arg9: memref<32x128xf32, #tpu.memory_space<vmem>>, %arg10: memref<32x128xf32, #tpu.memory_space<vmem>>) attributes {dimension_semantics = [#tpu.dimension_semantics<parallel>, #tpu.dimension_semantics<arbitrary>], iteration_bounds = array<i64: 2, 1>, scalar_prefetch = 0 : i64, scratch_operands = 4 : i64, tpu.core_type = #tpu.core_type<tc>, window_params = [{transform_indices = @transform_0, window_bounds = array<i64: 1, 32, 128>}, {pipeline_mode = #tpu.pipeline_mode<synchronous>, transform_indices = @transform_1, window_bounds = array<i64: 128, 32>}, {pipeline_mode = #tpu.pipeline_mode<synchronous>, transform_indices = @transform_2, window_bounds = array<i64: 128, 1>}, {pipeline_mode = #tpu.pipeline_mode<synchronous>, transform_indices = @transform_3, window_bounds = array<i64: 32, 128>}, {transform_indices = @transform_4, window_bounds = array<i64: 1, 1, 128>}]} {
    %c0_i32 = arith.constant 0 : i32
    %0 = arith.cmpi eq, %arg1, %c0_i32 : i32
    %1 = arith.extui %0 : i1 to i32
    %c0_i32_0 = arith.constant 0 : i32
    %2 = arith.cmpi ne, %1, %c0_i32_0 : i32
    scf.if %2 {
      %cst_33 = arith.constant -1.000000e+30 : f32
      %54 = vector.broadcast %cst_33 : f32 to vector<32x128xf32>
      %c0_34 = arith.constant 0 : index
      %c0_35 = arith.constant 0 : index
      %55 = vector.load %arg7[%c0_34, %c0_35] : memref<32x128xf32, #tpu.memory_space<vmem>>, vector<32x128xf32>
      tpu.vector_store %arg7[%c0_34, %c0_35], %54 {strides = array<i32>} : memref<32x128xf32, #tpu.memory_space<vmem>>, vector<32x128xf32>,
      %cst_36 = arith.constant 0.000000e+00 : f32
      %56 = vector.broadcast %cst_36 : f32 to vector<32x128xf32>
      %c0_37 = arith.constant 0 : index
      %c0_38 = arith.constant 0 : index
      %57 = vector.load %arg8[%c0_37, %c0_38] : memref<32x128xf32, #tpu.memory_space<vmem>>, vector<32x128xf32>
      tpu.vector_store %arg8[%c0_37, %c0_38], %56 {strides = array<i32>} : memref<32x128xf32, #tpu.memory_space<vmem>>, vector<32x128xf32>,
      %cst_39 = arith.constant 0.000000e+00 : f32
      %58 = vector.broadcast %cst_39 : f32 to vector<32x128xf32>
      %c0_40 = arith.constant 0 : index
      %c0_41 = arith.constant 0 : index
      %59 = vector.load %arg9[%c0_40, %c0_41] : memref<32x128xf32, #tpu.memory_space<vmem>>, vector<32x128xf32>
      tpu.vector_store %arg9[%c0_40, %c0_41], %58 {strides = array<i32>} : memref<32x128xf32, #tpu.memory_space<vmem>>, vector<32x128xf32>,
      %cst_42 = arith.constant 0.000000e+00 : f32
      %60 = vector.broadcast %cst_42 : f32 to vector<32x128xf32>
      %c0_43 = arith.constant 0 : index
      %c0_44 = arith.constant 0 : index
      %61 = vector.load %arg10[%c0_43, %c0_44] : memref<32x128xf32, #tpu.memory_space<vmem>>, vector<32x128xf32>
      tpu.vector_store %arg10[%c0_43, %c0_44], %60 {strides = array<i32>} : memref<32x128xf32, #tpu.memory_space<vmem>>, vector<32x128xf32>,
    } else {
    }
    %c0 = arith.constant 0 : index
    %c0_1 = arith.constant 0 : index
    %c0_2 = arith.constant 0 : index
    %3 = vector.load %arg2[%c0, %c0_1, %c0_2] : memref<1x32x128xf32, #tpu.memory_space<vmem>>, vector<1x32x128xf32>
    %4 = vector.shape_cast %3 : vector<1x32x128xf32> to vector<32x128xf32>
    %c0_3 = arith.constant 0 : index
    %c0_4 = arith.constant 0 : index
    %5 = vector.load %arg3[%c0_3, %c0_4] : memref<128x32xbf16, #tpu.memory_space<vmem>>, vector<128x32xbf16>
    %c0_5 = arith.constant 0 : index
    %c0_6 = arith.constant 0 : index
    %6 = vector.load %arg5[%c0_5, %c0_6] : memref<32x128xbf16, #tpu.memory_space<vmem>>, vector<32x128xbf16>
    %c0_7 = arith.constant 0 : index
    %c0_8 = arith.constant 0 : index
    %7 = vector.load %arg4[%c0_7, %c0_8] : memref<128x1xf32, #tpu.memory_space<vmem>>, vector<128x1xf32>
    %8 = arith.truncf %4 : vector<32x128xf32> to vector<32x128xbf16>
    %cst = arith.constant dense<0.000000e+00> : vector<128x128xf32>
    %9 = tpu.matmul %5, %8, %cst {dimension_numbers = #tpu.dot_dimension_numbers<[1], [0], [0], [1], [0, 0, 1, 1], [], []>} : vector<128x32xbf16>, vector<32x128xbf16>, vector<128x128xf32> -> vector<128x128xf32>
    %10 = vector.broadcast %7 : vector<128x1xf32> to vector<128x128xf32>
    %11 = arith.addf %9, %10 : vector<128x128xf32>
    %cst_9 = arith.constant 0.000000e+00 : f32
    %12 = vector.broadcast %cst_9 : f32 to vector<128x128xf32>
    %13 = arith.maximumf %11, %12 : vector<128x128xf32>
    %14 = arith.truncf %13 : vector<128x128xf32> to vector<128x128xbf16>
    %cst_10 = arith.constant dense<0.000000e+00> : vector<32x128xf32>
    %15 = tpu.matmul %6, %14, %cst_10 {dimension_numbers = #tpu.dot_dimension_numbers<[1], [0], [0], [1], [0, 0, 1, 1], [], []>} : vector<32x128xbf16>, vector<128x128xbf16>, vector<32x128xf32> -> vector<32x128xf32>
    %16 = tpu.iota {dimensions = array<i32: 1>} : vector<32x128xi32>
    %c128_i32 = arith.constant 128 : i32
    %17 = arith.muli %arg1, %c128_i32 : i32
    %18 = vector.broadcast %17 : i32 to vector<32x128xi32>
    %19 = arith.addi %16, %18 : vector<32x128xi32>
    %c8_i32 = arith.constant 8 : i32
    %20 = vector.broadcast %c8_i32 : i32 to vector<32x128xi32>
    %21 = arith.cmpi slt, %19, %20 : vector<32x128xi32>
    %cst_11 = arith.constant -1.000000e+30 : f32
    %22 = vector.broadcast %cst_11 : f32 to vector<32x128xf32>
    %23 = arith.select %21, %15, %22 : vector<32x128xi1>, vector<32x128xf32>
    %c0_12 = arith.constant 0 : index
    %c0_13 = arith.constant 0 : index
    %24 = vector.load %arg7[%c0_12, %c0_13] : memref<32x128xf32, #tpu.memory_space<vmem>>, vector<32x128xf32>
    %25 = arith.maximumf %24, %23 : vector<32x128xf32>
    %26 = arith.subf %24, %25 : vector<32x128xf32>
    %27 = math.exp %26 : vector<32x128xf32>
    %cst_14 = arith.constant 0.000000e+00 : f32
    %28 = vector.broadcast %cst_14 : f32 to vector<32x128xf32>
    %cst_15 = arith.constant 0.000000e+00 : f32
    %29 = vector.broadcast %cst_15 : f32 to vector<32x128xf32>
    %cst_16 = arith.constant 0.000000e+00 : f32
    %30 = vector.broadcast %cst_16 : f32 to vector<32x128xf32>
    %31 = arith.subf %23, %25 : vector<32x128xf32>
    %32 = math.exp %31 : vector<32x128xf32>
    %33 = arith.mulf %4, %32 : vector<32x128xf32>
    %34 = arith.addf %28, %32 : vector<32x128xf32>
    %35 = arith.addf %29, %33 : vector<32x128xf32>
    %36 = arith.mulf %4, %33 : vector<32x128xf32>
    %37 = arith.addf %30, %36 : vector<32x128xf32>
    %c0_17 = arith.constant 0 : index
    %c0_18 = arith.constant 0 : index
    %38 = vector.load %arg8[%c0_17, %c0_18] : memref<32x128xf32, #tpu.memory_space<vmem>>, vector<32x128xf32>
    %39 = arith.mulf %27, %38 : vector<32x128xf32>
    %40 = arith.addf %39, %34 : vector<32x128xf32>
    %c0_19 = arith.constant 0 : index
    %c0_20 = arith.constant 0 : index
    %41 = vector.load %arg8[%c0_19, %c0_20] : memref<32x128xf32, #tpu.memory_space<vmem>>, vector<32x128xf32>
    tpu.vector_store %arg8[%c0_19, %c0_20], %40 {strides = array<i32>} : memref<32x128xf32, #tpu.memory_space<vmem>>, vector<32x128xf32>,
    %c0_21 = arith.constant 0 : index
    %c0_22 = arith.constant 0 : index
    %42 = vector.load %arg9[%c0_21, %c0_22] : memref<32x128xf32, #tpu.memory_space<vmem>>, vector<32x128xf32>
    %43 = arith.mulf %27, %42 : vector<32x128xf32>
    %44 = arith.addf %43, %35 : vector<32x128xf32>
    %c0_23 = arith.constant 0 : index
    %c0_24 = arith.constant 0 : index
    %45 = vector.load %arg9[%c0_23, %c0_24] : memref<32x128xf32, #tpu.memory_space<vmem>>, vector<32x128xf32>
    tpu.vector_store %arg9[%c0_23, %c0_24], %44 {strides = array<i32>} : memref<32x128xf32, #tpu.memory_space<vmem>>, vector<32x128xf32>,
    %c0_25 = arith.constant 0 : index
    %c0_26 = arith.constant 0 : index
    %46 = vector.load %arg10[%c0_25, %c0_26] : memref<32x128xf32, #tpu.memory_space<vmem>>, vector<32x128xf32>
    %47 = arith.mulf %27, %46 : vector<32x128xf32>
    %48 = arith.addf %47, %37 : vector<32x128xf32>
    %c0_27 = arith.constant 0 : index
    %c0_28 = arith.constant 0 : index
    %49 = vector.load %arg10[%c0_27, %c0_28] : memref<32x128xf32, #tpu.memory_space<vmem>>, vector<32x128xf32>
    tpu.vector_store %arg10[%c0_27, %c0_28], %48 {strides = array<i32>} : memref<32x128xf32, #tpu.memory_space<vmem>>, vector<32x128xf32>,
    %c0_29 = arith.constant 0 : index
    %c0_30 = arith.constant 0 : index
    %50 = vector.load %arg7[%c0_29, %c0_30] : memref<32x128xf32, #tpu.memory_space<vmem>>, vector<32x128xf32>
    tpu.vector_store %arg7[%c0_29, %c0_30], %25 {strides = array<i32>} : memref<32x128xf32, #tpu.memory_space<vmem>>, vector<32x128xf32>,
    %c0_i32_31 = arith.constant 0 : i32
    %51 = arith.cmpi eq, %arg1, %c0_i32_31 : i32
    %52 = arith.extui %51 : i1 to i32
    %c0_i32_32 = arith.constant 0 : i32
    %53 = arith.cmpi ne, %52, %c0_i32_32 : i32
    scf.if %53 {
      %c0_33 = arith.constant 0 : index
      %c0_34 = arith.constant 0 : index
      %54 = vector.load %arg7[%c0_33, %c0_34] : memref<32x128xf32, #tpu.memory_space<vmem>>, vector<32x128xf32>
      %cst_35 = arith.constant dense<0xFF800000> : vector<32xf32>
      %55 = vector.multi_reduction <maximumf>, %54, %cst_35 [1] : vector<32x128xf32> to vector<32xf32>
      %56 = vector.shape_cast %55 : vector<32xf32> to vector<32x1xf32>
      %57 = vector.broadcast %56 : vector<32x1xf32> to vector<32x128xf32>
      %58 = arith.subf %54, %57 : vector<32x128xf32>
      %59 = math.exp %58 : vector<32x128xf32>
      %cst_36 = arith.constant 1.000000e+00 : f32
      %60 = vector.broadcast %cst_36 : f32 to vector<1x128xf32>
      %c0_37 = arith.constant 0 : index
      %c0_38 = arith.constant 0 : index
      %61 = vector.load %arg8[%c0_37, %c0_38] : memref<32x128xf32, #tpu.memory_space<vmem>>, vector<32x128xf32>
      %62 = arith.mulf %61, %59 : vector<32x128xf32>
      %cst_39 = arith.constant dense<0.000000e+00> : vector<1x32xf32>
      %63 = tpu.matmul %60, %62, %cst_39 {dimension_numbers = #tpu.dot_dimension_numbers<[1], [1], [0], [0], [0, 0, 1, 0], [], []>} : vector<1x128xf32>, vector<32x128xf32>, vector<1x32xf32> -> vector<1x32xf32>
      %c0_40 = arith.constant 0 : index
      %c0_41 = arith.constant 0 : index
      %64 = vector.load %arg9[%c0_40, %c0_41] : memref<32x128xf32, #tpu.memory_space<vmem>>, vector<32x128xf32>
      %65 = arith.mulf %64, %59 : vector<32x128xf32>
      %cst_42 = arith.constant dense<0.000000e+00> : vector<1x32xf32>
      %66 = tpu.matmul %60, %65, %cst_42 {dimension_numbers = #tpu.dot_dimension_numbers<[1], [1], [0], [0], [0, 0, 1, 0], [], []>} : vector<1x128xf32>, vector<32x128xf32>, vector<1x32xf32> -> vector<1x32xf32>
      %c0_43 = arith.constant 0 : index
      %c0_44 = arith.constant 0 : index
      %67 = vector.load %arg10[%c0_43, %c0_44] : memref<32x128xf32, #tpu.memory_space<vmem>>, vector<32x128xf32>
      %68 = arith.mulf %67, %59 : vector<32x128xf32>
      %cst_45 = arith.constant dense<0.000000e+00> : vector<1x32xf32>
      %69 = tpu.matmul %60, %68, %cst_45 {dimension_numbers = #tpu.dot_dimension_numbers<[1], [1], [0], [0], [0, 0, 1, 0], [], []>} : vector<1x128xf32>, vector<32x128xf32>, vector<1x32xf32> -> vector<1x32xf32>
      %cst_46 = arith.constant 1.000000e+00 : f32
      %70 = vector.broadcast %cst_46 : f32 to vector<1x32xf32>
      %71 = arith.divf %70, %63 : vector<1x32xf32>
      %72 = arith.mulf %66, %71 : vector<1x32xf32>
      %73 = arith.mulf %69, %71 : vector<1x32xf32>
      %74 = arith.mulf %72, %72 : vector<1x32xf32>
      %75 = arith.subf %73, %74 : vector<1x32xf32>
      %cst_47 = arith.constant 9.99999974E-6 : f32
      %76 = vector.broadcast %cst_47 : f32 to vector<1x32xf32>
      %77 = arith.maximumf %75, %76 : vector<1x32xf32>
      %78 = math.sqrt %77 : vector<1x32xf32>
      %79 = tpu.concatenate %72, %78 in 1 : vector<1x32xf32>, vector<1x32xf32> -> vector<1x64xf32>
      %cst_48 = arith.constant 0.000000e+00 : f32
      %80 = vector.broadcast %cst_48 : f32 to vector<1x64xf32>
      %81 = tpu.concatenate %79, %80 in 1 : vector<1x64xf32>, vector<1x64xf32> -> vector<1x128xf32>
      %c0_49 = arith.constant 0 : index
      %c0_50 = arith.constant 0 : index
      %c0_51 = arith.constant 0 : index
      %82 = vector.load %arg6[%c0_49, %c0_50, %c0_51] : memref<1x1x128xf32, #tpu.memory_space<vmem>>, vector<1x1x128xf32>
      %83 = vector.shape_cast %82 : vector<1x1x128xf32> to vector<1x128xf32>
      %84 = vector.shape_cast %81 : vector<1x128xf32> to vector<1x1x128xf32>
      tpu.vector_store %arg6[%c0_49, %c0_50, %c0_51], %84 {strides = array<i32>} : memref<1x1x128xf32, #tpu.memory_space<vmem>>, vector<1x1x128xf32>,
    } else {
    }
    return
  }
  func.func @transform_0(%arg0: i32, %arg1: i32) -> (i32, i32, i32) {
    %c0_i32 = arith.constant 0 : i32
    %c0_i32_0 = arith.constant 0 : i32
    return %arg0, %c0_i32, %arg1 : i32, i32, i32
  }
  func.func @transform_1(%arg0: i32, %arg1: i32) -> (i32, i32) {
    %c0_i32 = arith.constant 0 : i32
    %c0_i32_0 = arith.constant 0 : i32
    %c0_i32_1 = arith.constant 0 : i32
    return %c0_i32, %c0_i32_0 : i32, i32
  }
  func.func @transform_2(%arg0: i32, %arg1: i32) -> (i32, i32) {
    %c0_i32 = arith.constant 0 : i32
    %c0_i32_0 = arith.constant 0 : i32
    %c0_i32_1 = arith.constant 0 : i32
    return %c0_i32, %c0_i32_0 : i32, i32
  }
  func.func @transform_3(%arg0: i32, %arg1: i32) -> (i32, i32) {
    %c0_i32 = arith.constant 0 : i32
    %c0_i32_0 = arith.constant 0 : i32
    %c0_i32_1 = arith.constant 0 : i32
    return %c0_i32, %c0_i32_0 : i32, i32
  }
  func.func @transform_4(%arg0: i32, %arg1: i32) -> (i32, i32, i32) {
    %c0_i32 = arith.constant 0 : i32
    %c0_i32_0 = arith.constant 0 : i32
    %c0_i32_1 = arith.constant 0 : i32
    return %arg0, %c0_i32, %c0_i32_0 : i32, i32, i32
  }
}

</mosaic_0001>

<bundles_post_ra>
// kernel: tpu_custom_call.1
= control target key start
LH: loop header
LB: loop body
LE: loop exit
PB: predicated region body
PF: predicated region fallthrough
CT: control target
= control target key end

     0   :  { %9 = vsyncpa [#allocation7], 0  ;;  %s1686_s0 = inlined_call_operand.vmem [shape: f32[2,32,128], index: 0, kind: input, shape index: {}]   ;;  %s1687_s1 = inlined_call_operand.vmem [shape: bf16[128,32], index: 1, kind: input, shape index: {}]   ;;  %s1688_s2 = inlined_call_operand.vmem [shape: f32[128,1], index: 2, kind: input, shape index: {}]   ;;  %s1689_s3 = inlined_call_operand.vmem [shape: bf16[32,128], index: 3, kind: input, shape index: {}]   ;;  %s1690_s4 = inlined_call_operand.hbm [shape: f32[2,1,128], index: 4, kind: output, shape index: {}]  }
   0x1   :  { %11 = vsyncpa [#allocation7 + $0x1], 0  ;;  %s1455_s15 = smov 0   ;;  %s1457_s16 = smov 0  }
   0x2   :  { %s1459_s17 = smov 0   ;;  %s1461_s18 = smov 0  }
   0x3   :  { %s1463_s19 = smov 0   ;;  %s1465_s20 = smov 0  }
   0x4 LB: > { %s1087_s21 = sadd.s32 4294967295, %s1421_s20   ;;  %s1088_s22 = sadd.s32 4294967294, %s1421_s20   ;;  %s1421_s20 = sphi %s1465_s20, %s17_s20   ;;  %s1417_s19 = sphi %s1463_s19, %s1697_s19   ;;  %s1413_s18 = sphi %s1461_s18, %s1696_s18   ;;  %s1409_s17 = sphi %s1459_s17, %s1695_s17   ;;  %s1405_s16 = sphi %s1457_s16, %s1694_s16   ;;  %s1401_s15 = sphi %s1455_s15, %s1693_s15  }
   0x5   : > { %s29_s23 = sadd.s32 1, %s1417_s19  ;;  %s127_s24 = sadd.s32 1, %s1409_s17 }
   0x6   : > { %p31_p0 = scmp.ge.s32.totalorder %s29_s23, 2  ;;  %p137_p1 = scmp.ne.s32.totalorder %s1409_s17, %s1405_s16 }
   0x7   : > { %p138_p2 = scmp.eq.s32.totalorder %s1087_s21, 1  ;;  %p143_p3 = scmp.ne.s32.totalorder %s1405_s16, %s1401_s15 }
   0x8   : > { %s1699_s23 = smov (%p31_p0, %s29_s23), 0  ;;  %p144_p5 = scmp.eq.s32.totalorder %s1088_s22, 1 }
   0x9   : > { %p1495_p4 = por %p138_p2, %p137_p1  ;;  %s124_s26 = ssub.s32 %s1417_s19, %s1699_s23 }
   0xa   : > { %p1091_p6 = scmp.ge.s32.totalorder %s1421_s20, 1  ;;  %p125_p7 = scmp.eq.s32.totalorder %s124_s26, 0 }
   0xb   : > { %p1502_p8 = por %p144_p5, %p143_p3  ;;  %p182_p9 = scmp.lt.s32.totalorder %s1421_s20, 3 }
   0xc   : > { %s1508_s28 = scalar_select %p125_p7, %s1409_s17, %s127_s24  }
   0xd   : > { %p183_p10 = pnand %p1091_p6, %p182_p9 }
   0xe   : > { %p210_p11 = scmp.lt.s32.totalorder (!%p183_p10), %s1413_s18, 1  ;;  %v1305_v0 = vld [vmem:[%s1687_s1] sm:$0xff] (!%p183_p10)   ;;  %vm401_vm0 = vcmask (!%p183_p10), 261120   ;;  %v1423_v1 = vmov (!%p183_p10), 0   ;;  %v265_v9 = vld [vmem:[%s1688_s2 + $0x10] sm:$0xff] (!%p183_p10)  ;;  %v264_v10 = vld [vmem:[%s1688_s2 + $0x8] sm:$0xff] (!%p183_p10) }
   0xf   : > { %186 = sbr.rel (%p183_p10) target bundleno = 1064 (0x428), region = 36  ;;  %1155 = vmatprep.mubr.msk.bf16.mxu0 (!%p183_p10), %vm401_vm0, %v1305_v0  ;;  %1303 = vset.pattern.permute.xlu0 (!%p183_p10), %v1423_v1  ;;  %v263_v8 = vld [vmem:[%s1688_s2] sm:$0xff] (!%p183_p10)  ;;  %v266_v11 = vld [vmem:[%s1688_s2 + $0x18] sm:$0xff] (!%p183_p10)  ;;  %v1306_v12 = vld [vmem:[%s1687_s1 + $0x8] sm:$0xff] (!%p183_p10)   ;;  %vm1425_vm2 = vmmov (!%p183_p10), 0   ;;  %s1428_s12 = smov (!%p183_p10), 32  }
  0x10   : > { %1304 = vset.pattern.permute.xlu1 (!%p183_p10), %v1423_v1  ;;  %283 = vperm.xlu0 (!%p183_p10), %1303, %v263_v8   ;;  %v1307_v13 = vld [vmem:[%s1687_s1 + $0x10] sm:$0xff] (!%p183_p10)   ;;  %v267_v14 = vld [vmem:[%s1688_s2 + $0x20] sm:$0xff] (!%p183_p10)  ;;  %v268_v15 = vld [vmem:[%s1688_s2 + $0x28] sm:$0xff] (!%p183_p10)  ;;  %s208_s13 = sand.u32 (!%p183_p10), 1, %s1405_s16   ;;  %s1112_s14 = sshll.u32 (!%p183_p10), %s1413_s18, 4  ;;  %vm1002_vm5 = vcmask (!%p183_p10), 523264  }
  0x11   : > { %293 = vperm.xlu1 (!%p183_p10), %1304, %v265_v9   ;;  %v269_v16 = vld [vmem:[%s1688_s2 + $0x30] sm:$0xff] (!%p183_p10)  ;;  %v270_v17 = vld [vmem:[%s1688_s2 + $0x38] sm:$0xff] (!%p183_p10)  ;;  %v1309_v19 = vld [vmem:[%s1687_s1 + $0x20] sm:$0xff] (!%p183_p10)   ;;  %s209_s21 = scalar_lea.vmem (!%p183_p10), [#allocation6], %s208_s13  ;;  %s1639_s29 = scalar_lea.hbm (!%p183_p10), %s1690_s4, %s1112_s14 }
  0x12   : > { %v1308_v18 = vld [vmem:[%s1687_s1 + $0x18] sm:$0xff] (!%p183_p10)   ;;  %v271_v20 = vld [vmem:[%s1688_s2 + $0x40] sm:$0xff] (!%p183_p10)  ;;  %v272_v21 = vld [vmem:[%s1688_s2 + $0x48] sm:$0xff] (!%p183_p10)  ;;  %s1018_s22 = sshll.u32 (!%p183_p10), %s209_s21, 4  ;;  %s1006_s30 = scalar_lea.sflag (!%p183_p10), [#allocation7], %s208_s13  ;;  %s1641_s22 = int_to_ptr.vmem [resolvable:$true] %s1018_s22 }
  0x13   : > { %v273_v22 = vld [vmem:[%s1688_s2 + $0x50] sm:$0xff] (!%p183_p10)  ;;  %v274_v23 = vld [vmem:[%s1688_s2 + $0x58] sm:$0xff] (!%p183_p10)  ;;  %v1310_v24 = vld [vmem:[%s1687_s1 + $0x28] sm:$0xff] (!%p183_p10)  }
  0x14   : > { %288 = vperm.xlu0 (!%p183_p10), %1303, %v264_v10   ;;  %v1311_v25 = vld [vmem:[%s1687_s1 + $0x30] sm:$0xff] (!%p183_p10)   ;;  %v275_v26 = vld [vmem:[%s1688_s2 + $0x60] sm:$0xff] (!%p183_p10)  ;;  %v276_v27 = vld [vmem:[%s1688_s2 + $0x68] sm:$0xff] (!%p183_p10) }
  0x15   : > { %298 = vperm.xlu1 (!%p183_p10), %1304, %v266_v11   ;;  %v277_v28 = vld [vmem:[%s1688_s2 + $0x70] sm:$0xff] (!%p183_p10)  ;;  %v278_v29 = vld [vmem:[%s1688_s2 + $0x78] sm:$0xff] (!%p183_p10)  ;;  %v1313_v31 = vld [vmem:[%s1689_s3] sm:$0xff] (!%p183_p10)  }
  0x16   : > { %s211_s5 = scalar_select %p210_p11, %s1413_s18, 1  ;;  %v1312_v30 = vld [vmem:[%s1687_s1 + $0x38] sm:$0xff]   ;;  %1187 = vmatprep.mubr.bf16.mxu1 %v1313_v31 }
  0x17   : > { %s1343_s18 = scalar_lea.vmem %s1641_s22, 16 }
  0x18   : > { %s1115_s6 = sshll.u32 %s211_s5, 5  ;;  %303 = vperm.xlu0 %1303, %v267_v14   ;;  %p1344_p12 = scmp.ne.s32.totalorder %s1641_s22, %s1343_s18 }
  0x19   : > { %s217_s9 = scalar_lea.vmem %s1686_s0, %s1115_s6  ;;  %308 = vperm.xlu1 %1304, %v268_v15   ;;  %s1429_s5 = smov [#allocation6]  }
  0x1a   : > { %v1519_v2 = vld [vmem:[%s217_s9] sm:$0xff]  ;;  %v1521_v3 = vld [vmem:[%s217_s9 + $0x8] sm:$0xff]  ;;  %v1523_v4 = vld [vmem:[%s217_s9 + $0x10] sm:$0xff]  ;;  %p1345_p13 = pnand %p1344_p12, %p1495_p4  ;;  %s1347_s6 = sshll.u32 %s1429_s5, 4  ;;  %s1348_s6 = int_to_ptr.vmem [resolvable:$false] %s1347_s6 }
  0x1b   : > { %v279_v5 = vpack.c.bf16 %v1521_v3, %v1519_v2  ;;  %v1527_v6 = vld [vmem:[%s217_s9 + $0x18] sm:$0xff]  ;;  %s1349_s7 = scalar_lea.vmem %s1348_s6, 32  ;;  %p1350_p1 = scmp.lt.s32.totalorder %s1641_s22, %s1348_s6 }
  0x1c   : > { %v280_v7 = vpack.c.bf16 %v1527_v6, %v1523_v4  ;;  %313 = vperm.xlu0 %1303, %v269_v16   ;;  %p1346_p0 = pneg %p1345_p13  ;;  %p1351_p2 = scmp.lt.s32.totalorder %s1349_s7, %s1343_s18 }
  0x1d   : > { %1151 = vmatprep.subr.bf16.mxu0 %v279_v5  ;;  %318 = vperm.xlu1 %1304, %v270_v17  }
  0x1e   : > { %1152 = vmatpush3.bf16.msra.mxu0 %v279_v5  ;;  %p1352_p3 = por %p1351_p2, %p1350_p1 }
  0x1f   : > { %1153 = vmatprep.subr.bf16.mxu0 %v280_v7 }
  0x20   : > { %323 = vperm.xlu0 %1303, %v271_v20   ;;  %p1353_p5 = pnand %p1352_p3, %p1346_p0 }
  0x21   : > { %328 = vperm.xlu1 %1304, %v272_v21  }
  0x22   : > { %1154 = vmatpush3.bf16.msra.mxu0 %v280_v7 }
  0x24   : > { %333 = vperm.xlu0 %1303, %v273_v22  }
  0x25   : > { %1156 = vmatmul.mubr.msk.bf16.vlgmr.msra.gmra.mrb[0].mxu0 %vm401_vm0, %v1306_v12  ;;  %338 = vperm.xlu1 %1304, %v274_v23  }
  0x26   : > { %1159 = vmatprep.mubr.msk.bf16.mxu0 %vm401_vm0, %v1307_v13 }
  0x28   : > { %343 = vperm.xlu0 %1303, %v275_v26  }
  0x29   : > { %348 = vperm.xlu1 %1304, %v276_v27  }
  0x2c   : > { %353 = vperm.xlu0 %1303, %v277_v28  }
  0x2d   : > { %1160 = vmatmul.mubr.msk.bf16.gmra.mrb[4].mxu0 %vm401_vm0, %v1308_v18  ;;  %358 = vperm.xlu1 %1304, %v278_v29  }
  0x2e   : > { %1163 = vmatprep.mubr.msk.bf16.mxu0 %vm401_vm0, %v1309_v19 }
  0x35   : > { %1164 = vmatmul.mubr.msk.bf16.gmra.mrb[8].mxu0 %vm401_vm0, %v1310_v24 }
  0x36   : > { %1167 = vmatprep.mubr.msk.bf16.mxu0 %vm401_vm0, %v1311_v25 }
  0x3d   : > { %1168 = vmatmul.mubr.msk.bf16.gmra.mrb[12].mxu0 %vm401_vm0, %v1312_v30 }
  0x8f   : > { %v284_v32 = vpop.permute.xlu0 %283 }
  0x90   : > { %v294_v33 = vpop.permute.xlu1 %293 }
  0x93   : > { %v289_v34 = vpop.permute.xlu0 %288 }
  0x94   : > { %v299_v35 = vpop.permute.xlu1 %298 }
  0x97   : > { %v304_v36 = vpop.permute.xlu0 %303 }
  0x98   : > { %v309_v37 = vpop.permute.xlu1 %308 }
  0x9b   : > { %v314_v38 = vpop.permute.xlu0 %313 }
  0x9c   : > { %v319_v42 = vpop.permute.xlu1 %318 }
  0x9f   : > { %v324_v50 = vpop.permute.xlu0 %323 }
  0xa0   : > { %v329_v54 = vpop.permute.xlu1 %328 }
  0xa3   : > { %v334_v63 = vpop.permute.xlu0 %333 }
  0xa4   : > { %v339_v7 = vpop.permute.xlu1 %338 }
  0xa7   : > { %v344_v15 = vpop.permute.xlu0 %343 }
  0xa8   : > { %v349_v20 = vpop.permute.xlu1 %348 }
  0xab   : > { %v354_v27 = vpop.permute.xlu0 %353 }
  0xf8   : > { %v1157_v39 = vpop.f32.mrb[0].mxu0 }
  0xf9   : > { %v469_v40 = vadd.f32 %v1157_v39, %v294_v33  ;;  %v460_v41 = vpop.f32.mrb[1].mxu0 }
  0xfa   : > { %v461_v43 = vadd.f32 %v460_v41, %v284_v32  ;;  %v1158_v44 = vpop.f32.mrb[2].mxu0  ;;  %v359_v32 = vpop.permute.xlu1 %358 }
  0xfb   : > { %v472_v45 = vadd.f32 %v1158_v44, %v299_v35  ;;  %v463_v46 = vpop.f32.mrb[3].mxu0  ;;  %v525_v48 = vmax.f32 %v469_v40, 0.0  ;;  %v1314_v44 = vld [vmem:[%s1689_s3 + $0x8] sm:$0xff]  }
  0xfc   : > { %v464_v47 = vadd.f32 %v463_v46, %v289_v34  ;;  %v523_v51 = vmax.f32 %v461_v43, 0.0 }
  0xfd   : > { %v526_v49 = vmax.f32 %v472_v45, 0.0  ;;  %v608_v45 = vlaneseq }
  0xfe   : > { %v524_v52 = vmax.f32 %v464_v47, 0.0 }
  0xff   : > { %v540_v53 = vpack.c.bf16 %v526_v49, %v525_v48  ;;  %v609_v46 = vand.u32 127, %v608_v45 }
 0x100   : > { %v1161_v55 = vpop.f32.mrb[4].mxu0  ;;  %v539_v56 = vpack.c.bf16 %v524_v52, %v523_v51 }
 0x101   : > { %v485_v57 = vadd.f32 %v1161_v55, %v314_v38  ;;  %v476_v58 = vpop.f32.mrb[5].mxu0  ;;  %vm613_vm1 = vcmp.lt.s32.totalorder %v609_v46, 8 }
 0x102   : > { %v477_v59 = vadd.f32 %v476_v58, %v304_v36  ;;  %v1162_v60 = vpop.f32.mrb[6].mxu0  ;;  %1171 = vmatprep.subr.bf16.mxu1 %v539_v56 }
 0x103   : > { %v488_v61 = vadd.f32 %v1162_v60, %v319_v42  ;;  %v479_v62 = vpop.f32.mrb[7].mxu0  ;;  %1172 = vmatpush3.bf16.msra.mxu1 %v539_v56  ;;  %v529_v1 = vmax.f32 %v485_v57, 0.0  ;;  %v1426_v60 = vmov 0.0  }
 0x104   : > { %v480_v0 = vadd.f32 %v479_v62, %v309_v37  ;;  %1173 = vmatprep.subr.bf16.mxu1 %v540_v53  ;;  %v527_v8 = vmax.f32 %v477_v59, 0.0  ;;  %v1424_v59 = vmov 0.0|0.0   ;;  %1199 = vmatprep.mubr.msk.f32.mxu0 %vm1425_vm2, %v1426_v60 }
 0x105   : > { %v530_v5 = vmax.f32 %v488_v61, 0.0  ;;  %1224 = vmatprep.subr.bf16.mxu0 %v1424_v59 }
 0x106   : > { %v528_v9 = vmax.f32 %v480_v0, 0.0 }
 0x107   : > { %v542_v10 = vpack.c.bf16 %v530_v5, %v529_v1  ;;  %1174 = vmatpush3.bf16.msra.mxu1 %v540_v53 }
 0x108   : > { %v541_v11 = vpack.c.bf16 %v528_v9, %v527_v8  ;;  %v1165_v12 = vpop.f32.mrb[8].mxu0 }
 0x109   : > { %v501_v13 = vadd.f32 %v1165_v12, %v334_v63  ;;  %v492_v14 = vpop.f32.mrb[9].mxu0 }
 0x10a   : > { %v493_v16 = vadd.f32 %v492_v14, %v324_v50  ;;  %v1166_v17 = vpop.f32.mrb[10].mxu0  ;;  %1175 = vmatprep.subr.bf16.mxu1 %v541_v11 }
 0x10b   : > { %v504_v18 = vadd.f32 %v1166_v17, %v339_v7  ;;  %v495_v19 = vpop.f32.mrb[11].mxu0  ;;  %1176 = vmatpush3.bf16.msra.mxu1 %v541_v11  ;;  %v533_v22 = vmax.f32 %v501_v13, 0.0 }
 0x10c   : > { %v496_v21 = vadd.f32 %v495_v19, %v329_v54  ;;  %1177 = vmatprep.subr.bf16.mxu1 %v542_v10  ;;  %v531_v24 = vmax.f32 %v493_v16, 0.0 }
 0x10d   : > { %v534_v23 = vmax.f32 %v504_v18, 0.0 }
 0x10e   : > { %v532_v25 = vmax.f32 %v496_v21, 0.0 }
 0x10f   : > { %v544_v26 = vpack.c.bf16 %v534_v23, %v533_v22  ;;  %1178 = vmatpush3.bf16.msra.mxu1 %v542_v10 }
 0x110   : > { %v543_v28 = vpack.c.bf16 %v532_v25, %v531_v24  ;;  %v1169_v29 = vpop.f32.mrb[12].mxu0 }
 0x111   : > { %v517_v30 = vadd.f32 %v1169_v29, %v354_v27  ;;  %v508_v31 = vpop.f32.mrb[13].mxu0 }
 0x112   : > { %v509_v33 = vadd.f32 %v508_v31, %v344_v15  ;;  %v1170_v34 = vpop.f32.mrb[14].mxu0  ;;  %1179 = vmatprep.subr.bf16.mxu1 %v543_v28 }
 0x113   : > { %v520_v35 = vadd.f32 %v1170_v34, %v359_v32  ;;  %v511_v36 = vpop.f32.mrb[15].mxu0  ;;  %1180 = vmatpush3.bf16.msra.mxu1 %v543_v28  ;;  %v537_v38 = vmax.f32 %v517_v30, 0.0 }
 0x114   : > { %v512_v37 = vadd.f32 %v511_v36, %v349_v20  ;;  %1181 = vmatprep.subr.bf16.mxu1 %v544_v26  ;;  %v535_v40 = vmax.f32 %v509_v33, 0.0 }
 0x115   : > { %v538_v39 = vmax.f32 %v520_v35, 0.0 }
 0x116   : > { %v536_v41 = vmax.f32 %v512_v37, 0.0 }
 0x117   : > { %v546_v42 = vpack.c.bf16 %v538_v39, %v537_v38  ;;  %1182 = vmatpush3.bf16.msra.mxu1 %v544_v26 }
 0x118   : > { %v545_v43 = vpack.c.bf16 %v536_v41, %v535_v40 }
 0x11a   : > { %1183 = vmatprep.subr.bf16.mxu1 %v545_v43 }
 0x11b   : > { %1184 = vmatpush3.bf16.msra.mxu1 %v545_v43 }
 0x11c   : > { %1185 = vmatprep.subr.bf16.mxu1 %v546_v42 }
 0x11f   : > { %1186 = vmatpush3.bf16.msra.mxu1 %v546_v42 }
 0x120   : > { %1230 = vmatprep.subr.bf16.mxu1 %v1424_v59 }
 0x122   : > { %1188 = vmatmul.mubr.bf16.vlgmr.msra.gmra.mrb[0].mxu1 %v1314_v44 }
 0x123   : > { %1210 = vmatprep.mubr.msk.f32.mxu1 %vm1425_vm2, %v1426_v60 }
 0x1f5   : > { %v1189_v47 = vpop.f32.mrb[0].mxu1 }
 0x1f6   : > { %v593_v48 = vpop.f32.mrb[1].mxu1  ;;  %v616_v53 = vsel %vm613_vm1, %v1189_v47, -1e+30 }
 0x1f7   : > { %v614_v49 = vsel %vm613_vm1, %v593_v48, -1e+30  ;;  %v1190_v50 = vpop.f32.mrb[2].mxu1  ;;  %v624_v56 = vmax.f32 %v616_v53, -1e+30 }
 0x1f8   : > { %v622_v51 = vmax.f32 %v614_v49, -1e+30  ;;  %v596_v52 = vpop.f32.mrb[3].mxu1  ;;  %v617_v57 = vsel %vm613_vm1, %v1190_v50, -1e+30 }
 0x1f9   : > { %v615_v54 = vsel %vm613_vm1, %v596_v52, -1e+30  ;;  %v625_v58 = vmax.f32 %v617_v57, -1e+30  ;;  %v640_v63 = vsub.f32 %v616_v53, %v624_v56  ;;  %v628_v10 = vsub.f32 -1e+30, %v624_v56 }
 0x1fa   : > { %v623_v55 = vmax.f32 %v615_v54, -1e+30  ;;  %729 = vmax.xlane.f32.xlu0 %v622_v51  ;;  %v638_v62 = vsub.f32 %v614_v49, %v622_v51  ;;  %v626_v0 = vsub.f32 -1e+30, %v622_v51 }
 0x1fb   : > { %v641_v8 = vsub.f32 %v617_v57, %v625_v58  ;;  %v646_v9 = vmul.f32 1.442695, %v640_v63  ;;  %v629_v13 = vsub.f32 -1e+30, %v625_v58  ;;  %v634_v15 = vmul.f32 1.442695, %v628_v10 }
 0x1fc   : > { %731 = vmax.xlane.f32.xlu1 %v623_v55  ;;  %v639_v61 = vsub.f32 %v615_v54, %v623_v55  ;;  %v627_v1 = vsub.f32 -1e+30, %v623_v55  ;;  %v642_v7 = vmul.f32 1.442695, %v638_v62  ;;  %v630_v11 = vmul.f32 1.442695, %v626_v0 }
 0x1fd   : > { %v648_v14 = vmul.f32 1.442695, %v641_v8  ;;  %v636_v16 = vmul.f32 1.442695, %v629_v13 }
 0x1fe   : > { %733 = vmax.xlane.f32.xlu0 %v624_v56  ;;  %v644_v5 = vmul.f32 1.442695, %v639_v61  ;;  %v632_v12 = vmul.f32 1.442695, %v627_v1 }
 0x200   : > { %1315 = vpow2.f32 %v644_v5 }
 0x201   : > { %1317 = vpow2.f32 %v642_v7 }
 0x202   : > { %735 = vmax.xlane.f32.xlu0 %v625_v58  ;;  %1319 = vpow2.f32 %v646_v9 }
 0x203   : > { %1321 = vpow2.f32 %v630_v11 }
 0x204   : > { %1323 = vpow2.f32 %v632_v12 }
 0x205   : > { %1325 = vpow2.f32 %v648_v14 }
 0x206   : > { %1327 = vpow2.f32 %v634_v15 }
 0x207   : > { %1329 = vpow2.f32 %v636_v16 }
 0x20a   : > { %v1316_v23 = vpop.eup %1315 }
 0x20b   : > { %v1318_v26 = vpop.eup %1317  ;;  %v651_v31 = vmul.f32 %v1316_v23, %v1521_v3 }
 0x20c   : > { %v1320_v27 = vpop.eup %1319  ;;  %v650_v34 = vmul.f32 %v1318_v26, %v1519_v2 }
 0x20d   : > { %v1322_v29 = vpop.eup %1321  ;;  %v652_v38 = vmul.f32 %v1320_v27, %v1523_v4  ;;  %v663_v41 = vmul.f32 %v651_v31, %v1521_v3 }
 0x20e   : > { %v1324_v32 = vpop.eup %1323  ;;  %v674_v36 = vmul.f32 0.0, %v1322_v29  ;;  %v662_v43 = vmul.f32 %v650_v34, %v1519_v2 }
 0x20f   : > { %v1326_v35 = vpop.eup %1325  ;;  %v675_v40 = vmul.f32 0.0, %v1324_v32  ;;  %v664_v48 = vmul.f32 %v652_v38, %v1523_v4 }
 0x210   : > { %v1328_v39 = vpop.eup %1327  ;;  %v653_v42 = vmul.f32 %v1326_v35, %v1527_v6  ;;  %v678_v47 = vadd.f32 %v1318_v26, %v674_v36  ;;  %v694_v50 = vadd.f32 %v674_v36, %v650_v34 }
 0x211   : > { %v1330_v44 = vpop.eup %1329  ;;  %v676_v46 = vmul.f32 0.0, %v1328_v39  ;;  %v679_v49 = vadd.f32 %v1316_v23, %v675_v40  ;;  %v711_v52 = vadd.f32 %v675_v40, %v663_v41 }
 0x212   : > { %v677_v54 = vmul.f32 0.0, %v1330_v44  ;;  %v665_v3 = vmul.f32 %v653_v42, %v1527_v6 }
 0x213   : > { %v680_v5 = vadd.f32 %v1320_v27, %v676_v46  ;;  %v696_v4 = vadd.f32 %v676_v46, %v652_v38  ;;  %v712_v8 = vadd.f32 %v676_v46, %v664_v48 }
 0x214   : > { %v681_v9 = vadd.f32 %v1326_v35, %v677_v54  ;;  %v697_v10 = vadd.f32 %v677_v54, %v653_v42  ;;  %v713_v11 = vadd.f32 %v677_v54, %v665_v3 }
 0x287   : > { %v730_v17 = vpop.xlane.xlu0 %729 }
 0x288   : > { %v737_v18 = vsub.f32 %v622_v51, %v730_v17  ;;  %v695_v51 = vadd.f32 %v675_v40, %v651_v31 }
 0x289   : > { %v732_v19 = vpop.xlane.xlu1 %731 }
 0x28a   : > { %v741_v20 = vmul.f32 1.442695, %v737_v18  ;;  %v738_v21 = vsub.f32 %v623_v55, %v732_v19 }
 0x28b   : > { %v734_v22 = vpop.xlane.xlu0 %733 }
 0x28c   : > { %1331 = vpow2.f32 %v741_v20  ;;  %v743_v24 = vmul.f32 1.442695, %v738_v21  ;;  %v739_v25 = vsub.f32 %v624_v56, %v734_v22  ;;  %v710_v56 = vadd.f32 %v674_v36, %v662_v43 }
 0x28d   : > { %v1427_v21 = vmov 1.0  }
 0x28e   : > { %1333 = vpow2.f32 %v743_v24  ;;  %v745_v28 = vmul.f32 1.442695, %v739_v25 }
 0x28f   : > { %v736_v30 = vpop.xlane.xlu0 %735 }
 0x290   : > { %v740_v33 = vsub.f32 %v625_v58, %v736_v30  ;;  %1335 = vpow2.f32 %v745_v28 }
 0x292   : > { %v747_v37 = vmul.f32 1.442695, %v740_v33 }
 0x294   : > { %1337 = vpow2.f32 %v747_v37 }
 0x296   : > { %v1332_v45 = vpop.eup %1331 }
 0x297   : > { %v753_v55 = vmul.f32 %v1332_v45, %v678_v47  ;;  %v831_v58 = vmul.f32 %v1332_v45, %v694_v50  ;;  %v909_v62 = vmul.f32 %v1332_v45, %v710_v56 }
 0x298   : > { %v1334_v53 = vpop.eup %1333 }
 0x299   : > { %v754_v57 = vmul.f32 %v1334_v53, %v679_v49  ;;  %v832_v61 = vmul.f32 %v1334_v53, %v695_v51  ;;  %v910_v2 = vmul.f32 %v1334_v53, %v711_v52 }
 0x29a   : > { %v1336_v63 = vpop.eup %1335 }
 0x29b   : > { %v1225_v0 = vpack.c.bf16 %v754_v57, %v753_v55  ;;  %v1231_v1 = vpack.c.bf16 %v832_v61, %v831_v58  ;;  %v1237_v7 = vpack.c.bf16 %v910_v2, %v909_v62  ;;  %v755_v6 = vmul.f32 %v1336_v63, %v680_v5 }
 0x29c   : > { %v833_v13 = vmul.f32 %v1336_v63, %v696_v4  ;;  %v911_v16 = vmul.f32 %v1336_v63, %v712_v8 }
 0x29d   : > { %1226 = vmatpush3.bf16.xpose.msra.mxu0 %v1225_v0  ;;  %1232 = vmatpush3.bf16.xpose.msra.mxu1 %v1231_v1 }
 0x29e   : > { %v1338_v12 = vpop.eup %1337  ;;  %1227 = vmatprep.subr.bf16.mxu0 %v1424_v59  ;;  %1233 = vmatprep.subr.bf16.mxu1 %v1424_v59 }
 0x29f   : > { %v756_v14 = vmul.f32 %v1338_v12, %v681_v9  ;;  %v834_v15 = vmul.f32 %v1338_v12, %v697_v10  ;;  %v912_v17 = vmul.f32 %v1338_v12, %v713_v11 }
 0x2a1   : > { %v1228_v18 = vpack.c.bf16 %v756_v14, %v755_v6  ;;  %v1234_v19 = vpack.c.bf16 %v834_v15, %v833_v13  ;;  %v1240_v20 = vpack.c.bf16 %v912_v17, %v911_v16 }
 0x2a5   : > { %1229 = vmatpush3.bf16.xpose.msra.mxu0 %v1228_v18  ;;  %1235 = vmatpush3.bf16.xpose.msra.mxu1 %v1234_v19 }
 0x2a6   : > { %1236 = vmatprep.subr.bf16.mxu0 %v1424_v59 }
 0x2ac   : > { %1200 = vmatmul.mubr.f32.vlgmr.msra.gmra.mrb[16].mxu0 %v1427_v21  ;;  %1211 = vmatmul.mubr.f32.vlgmr.msra.gmra.mrb[4].mxu1 %v1427_v21 }
 0x2ad   : > { %1238 = vmatpush3.bf16.xpose.msra.mxu0 %v1237_v7  ;;  %1221 = vmatprep.mubr.msk.f32.mxu0 %vm1425_vm2, %v1426_v60 }
 0x2ae   : > { %1239 = vmatprep.subr.bf16.mxu0 %v1424_v59 }
 0x2b5   : > { %1241 = vmatpush3.bf16.xpose.msra.mxu0 %v1240_v20 }
 0x2bc   : > { %1222 = vmatmul.mubr.f32.vlgmr.msra.gmra.mrb[18].mxu0 %v1427_v21 }
 0x37f   : > { %v823_v22 = vpop.f32.mrb[16].mxu0  ;;  %v901_v23 = vpop.f32.mrb[4].mxu1 }
 0x380   : > { %1339 = vrcp.f32 %v823_v22  ;;  %v1201_v24 = vpop.f32.mrb[17].mxu0  ;;  %v1212_v25 = vpop.f32.mrb[5].mxu1 }
 0x38a   : > { %v1340_v26 = vpop.eup %1339 }
 0x38b   : > { %v985_v27 = vmul.f32 %v1340_v26, %v901_v23 }
 0x38d   : > { %v987_v29 = vmul.f32 %v985_v27, %v985_v27 }
 0x38f   : > { %v979_v28 = vpop.f32.mrb[18].mxu0 }
 0x390   : > { %v986_v30 = vmul.f32 %v1340_v26, %v979_v28  ;;  %v1223_v31 = vpop.f32.mrb[19].mxu0 }
 0x392   : > { %v988_v32 = vsub.f32 %v986_v30, %v987_v29 }
 0x394   : > { %v989_v33 = vmax.f32 %v988_v32, 1e-05 }
 0x396   : > { %1341 = vrsqrt.f32 %v989_v33  ;;  %vm992_vm3 = vcmp.eq.f32.partialorder %v989_v33, inf  ;;  %v995_v34 = vand.u32 2147483648, %v989_v33  ;;  %vm994_vm4 = vcmp.eq.f32.partialorder %v989_v33, 0.0 }
 0x3a0   : > { %v1342_v60 = vpop.eup %1341 }
 0x3a1   : > { %v991_v59 = vmul.f32 %v1342_v60, %v989_v33 }
 0x3a3   : > { %v993_v35 = vsel %vm992_vm3, %v989_v33, %v991_v59 }
 0x3a4   : > { %v996_v36 = vsel %vm994_vm4, %v995_v34, %v993_v35 }
 0x3a5   : > { %998 = vrot.lane.b32.xlu1 %v996_v36, %s1428_s12 }
 0x417   : > { %v999_v37 = vpop.permute.xlu1 %998 }
 0x418   : > { %v1001_v38 = vsel %vm401_vm0, %v985_v27, %v999_v37 }
 0x419   : > { %v1003_v39 = vsel %vm1002_vm5, %v1001_v38, 0.0 }
 0x41a   : > { %1004 = vst [vmem:[%s209_s21] sm:$0x1] %v1003_v39 }
 0x41b   : > { %1356 = shalt.err (!%p1353_p5)
}
 0x41c   : > { %s1357_s8 = scalar_lea.hbm %s1639_s29, 16  ;;  %s1361_s11 = scalar_lea.hbm %s1690_s4, 32 }
 0x41d   : > { %p1358_p6 = scmp.ne.s32.totalorder %s1639_s29, %s1357_s8  ;;  %p1362_p10 = scmp.lt.u32.totalorder %s1639_s29, %s1690_s4 }
 0x41e   : > { %p1363_p11 = scmp.lt.u32.totalorder %s1361_s11, %s1357_s8  ;;  %p1365_p13 = scmp.lt.u32.totalorder %s1357_s8, %s1639_s29 }
 0x41f   : > { %p1359_p7 = pnand %p1358_p6, %p1495_p4 }
 0x420   : > { %p1364_p12 = por %p1363_p11, %p1362_p10 }
 0x421   : > { %p1360_p9 = pneg %p1359_p7 }
 0x422   : > { %p1366_p0 = por %p1365_p13, %p1364_p12 }
 0x424   : > { %p1367_p1 = pnand %p1366_p0, %p1360_p9 }
 0x426   : > { %1370 = shalt.err (!%p1367_p1)
}
 0x427   : > { %1242 = dma.vmem_to_hbm [thread:$0]  (%p1495_p4), %s1641_s22, 16, %s1639_s29, %s1006_s30  }
 0x428 PF: > { %p1248_p2 = scmp.ge.s32.totalorder %s1421_s20, 2  ;;  %s1030_s14 = sand.u32 1, %s1401_s15  }
 0x429   : > { %s1031_s21 = scalar_lea.sflag [#allocation7], %s1030_s14 }
 0x42a   : > { %p1245_p3 = pnand %p1248_p2, %p1502_p8 }
 0x42c   : > { %1396 = dma.done.wait (!%p1245_p3), %s1031_s21, 16  }
 0x42d   : > { %1398 = vsyncadd (!%p1245_p3), %s1031_s21, 4294967280  ;;  %s17_s20 = sadd.s32 1, %s1421_s20   ;;  %s1693_s15 = smov %s1405_s16 }
 0x42e   : > { %p14_p5 = scmp.ge.s32.totalorder %s17_s20, 4   ;;  %s1694_s16 = smov %s1409_s17 }
 0x42f   : > { %s1695_s17 = smov %s1508_s28  ;;  %s1696_s18 = smov %s1417_s19 }
 0x430   : > { %s1697_s19 = smov %s1699_s23  ;;  %16 = sbr.rel (!%p14_p5) target bundleno = 4 (0x4), region = 79 }
 0x437   :  { %1035 = vsyncpa [#allocation7], 1 }
 0x438   :  { %1037 = vsyncpa [#allocation7 + $0x1], 1 }

</bundles_post_ra>
